<compile_context>
chip_gen: v6e
topology: v6e:2x2x1
jax: 0.10.0
libtpu: 0.0.40
codegen_flags: <defaults>
</compile_context>

<pallas_src>
import functools

import jax
import jax.numpy as jnp
from jax.experimental import pallas as pl
from jax.experimental.pallas import tpu as pltpu


# ----------------------------- helpers --------------------------------------


def _round_up(x, m):
    return (x + m - 1) // m * m


def _vmem_budget():
    """Per-generation VMEM budget (128 MiB v5e/v6e, 64 MiB v7x) with headroom."""
    try:
        cap = pltpu.get_tpu_info().vmem_capacity_bytes
    except Exception:
        cap = 64 << 20                      # conservative (v7x physical) fallback
    limit = min(cap * 3 // 4, 96 << 20)     # raise the scoped-VMEM limit
    budget = limit // 2                     # tile-picking headroom (double buffers etc.)
    return int(budget), int(limit)


def _pick_group(n, s, per_sample_bytes, fixed_bytes, budget_bytes):
    """Largest samples-per-grid-step k (dividing N) whose lane block k*S is a
    multiple of 128 (or covers the whole batch) and whose VMEM footprint --
    including the resident weight block -- fits the budget."""
    valid = [k for k in range(1, n + 1)
             if n % k == 0 and ((k * s) % 128 == 0 or k == n)]
    fitting = [k for k in valid if fixed_bytes + k * per_sample_bytes <= budget_bytes]
    if fitting:
        return max(fitting)
    # TODO(synk): for huge per-sample maps add spatial tiling instead of
    # falling back to the smallest legal group.
    return min(valid)


# ----------------------------- kernels ---------------------------------------


def _conv_stats_kernel(xw_ref, w8_ref, y_ref, sum_ref, ssq_ref, *, k, s, wo):
    """Pass 1: LeakyReLU + 4x4/stride-2 conv (two row-shifted MXU matmuls per
    sample, built from one VMEM-resident slab) + per-sample channel stats."""
    w_top = w8_ref[0]                       # [Cout, 8*Cin] : kernel rows kh in {0,1}
    w_bot = w8_ref[1]                       # [Cout, 8*Cin] : kernel rows kh in {2,3}
    for i in range(k):                      # static unroll over this group's samples
        xi = xw_ref[i]                      # [8*Cin, (Ho+1)*Wo] bf16 slab
        # LeakyReLU(0.2); exact on the zero padding.  Kept in bf16 (v6e/v7x VPU;
        # v5e lowers via internal widening) to halve VALU/vreg footprint.
        xi = jnp.where(xi >= 0, xi, xi * 0.2)
        acc = jnp.dot(w_top, xi[:, 0:s], preferred_element_type=jnp.float32)
        acc += jnp.dot(w_bot, xi[:, wo:wo + s], preferred_element_type=jnp.float32)
        y_ref[:, i * s:(i + 1) * s] = acc.astype(y_ref.dtype)
        sum_ref[i] = jnp.sum(acc, axis=-1, keepdims=True)
        ssq_ref[i] = jnp.sum(acc * acc, axis=-1, keepdims=True)


def _bn_ca_precompute_kernel(sum_ref, ssq_ref, gamma_ref, beta_ref,
                             w1_ref, b1_ref, w2_ref, b2_ref,
                             scale_ref, shift_ref, wca_ref,
                             *, m_total, s_total, n):
    """Pass 2 (runs once): global BN batch statistics + per-sample CA gates.
    All the O(N*Cout) rsqrt/sigmoid/tiny-matmul work hoisted out of the
    streaming loop."""
    tot = jnp.sum(sum_ref[...], axis=0)                 # [Cout, 1]
    totsq = jnp.sum(ssq_ref[...], axis=0)               # [Cout, 1]
    mean = tot * (1.0 / m_total)
    var = totsq * (1.0 / m_total) - mean * mean         # single-pass variance ...
    var = jnp.maximum(var, 0.0)                         # ... clamped (cancellation)
    inv = jax.lax.rsqrt(var + 1e-5)
    scale = gamma_ref[...] * inv
    shift = beta_ref[...] - mean * scale
    scale_ref[...] = scale
    shift_ref[...] = shift
    for i in range(n):                                   # static unroll over batch
        # global avg pool of xbn derived from sum(y) (pooling is linear).
        pooled = sum_ref[i] * (1.0 / s_total) * scale + shift         # [Cout, 1]
        h = jnp.dot(w1_ref[...], pooled, preferred_element_type=jnp.float32) + b1_ref[...]
        h = jnp.maximum(h, 0.0)
        g = jnp.dot(w2_ref[...], h, preferred_element_type=jnp.float32) + b2_ref[...]
        wca_ref[i] = jax.nn.sigmoid(g)


def _bn_ca_apply_kernel(y_ref, scale_ref, shift_ref, wca_ref, xbn_ref, xca_ref,
                        *, k, s):
    """Pass 3: streaming BN + ChannelAttention apply over [Cout, k*S] tiles."""
    xbn = y_ref[...].astype(jnp.float32) * scale_ref[...] + shift_ref[...]
    xbn_ref[...] = xbn.astype(xbn_ref.dtype)
    for i in range(k):                                   # per-sample channel gate
        xca_ref[:, i * s:(i + 1) * s] = (
            xbn[:, i * s:(i + 1) * s] * wca_ref[i]).astype(xca_ref.dtype)


# ----------------------------- wrapper ---------------------------------------


def down_forward(x_nchw, params, ca_kernel):
    w_conv = params["downconv_w"]                 # [Cout, Cin, 4, 4]
    gamma, beta = params["bn_gamma"], params["bn_beta"]
    w1, b1 = params["ca_w1"], params["ca_b1"]     # [Cout//4, Cout, 1, 1], [Cout//4]
    w2, b2 = params["ca_w2"], params["ca_b2"]     # [Cout, Cout//4, 1, 1], [Cout]

    N, Cin, H, W = x_nchw.shape
    Cout = w_conv.shape[0]
    C4 = Cout // 4
    assert H % 2 == 0 and W % 2 == 0
    Ho, Wo = (H + 2 - 4) // 2 + 1, (W + 2 - 4) // 2 + 1
    Hp = Ho + 1                                    # rows after pad + space-to-depth
    S = Ho * Wo
    PW = Hp * Wo
    K8 = 8 * Cin
    # PyTorch's x * weight broadcast only works when the avg-pooled map is 1x1.
    assert ca_kernel == Ho == Wo, "kernel supports ca_kernel == downsampled spatial size"
    # TODO(synk): the ca_kernel == 1 (per-pixel attention) variant is not implemented.

    # --- glue: pure layout, no arithmetic.  pad(1) + space-to-depth(2) +
    # column-phase split -> xw[N, 8*Cin, Hp*Wo] bf16 (~1x the size of x). ---
    xpad = jnp.pad(x_nchw, ((0, 0), (0, 0), (1, 1), (1, 1))).astype(jnp.bfloat16)
    xr = xpad.reshape(N, Cin, Hp, 2, Wo + 1, 2)
    xs = xr.transpose(0, 3, 5, 1, 2, 4).reshape(N, 4 * Cin, Hp, Wo + 1)
    xw = jnp.concatenate([xs[..., 0:Wo], xs[..., 1:Wo + 1]], axis=1)
    xw = xw.reshape(N, K8, PW)

    # Conv weights regrouped to match xw's channel order:
    #   W8[dh, co, dw*4Cin + (2*ph+pw)*Cin + ci] = w[co, ci, 2*dh+ph, 2*dw+pw]
    w6 = w_conv.reshape(Cout, Cin, 2, 2, 2, 2)
    w8 = w6.transpose(2, 0, 4, 3, 5, 1).reshape(2, Cout, K8).astype(jnp.bfloat16)

    gamma_m = gamma.reshape(Cout, 1).astype(jnp.float32)
    beta_m = beta.reshape(Cout, 1).astype(jnp.float32)
    w1_m = w1.reshape(C4, Cout).astype(jnp.float32)
    b1_m = b1.reshape(C4, 1).astype(jnp.float32)
    w2_m = w2.reshape(Cout, C4).astype(jnp.float32)
    b2_m = b2.reshape(Cout, 1).astype(jnp.float32)

    budget, vmem_limit = _vmem_budget()
    pw128 = _round_up(PW, 128)
    s128 = _round_up(S, 128)

    # ---- pass 1: LeakyReLU + conv (two shifted matmuls) + per-sample stats ----
    per1 = (2 * 2 * K8 * pw128              # xw slab, double-buffered (bf16)
            + 2 * K8 * pw128                # in-kernel leaky / slice temporaries
            + 2 * 2 * Cout * s128           # y block, double-buffered (bf16)
            + 2 * 4 * Cout * s128           # f32 accumulator + cast temp
            + 4 * 4 * Cout * 8)             # per-sample sums / ssq
    fixed1 = 2 * (2 * Cout * K8 * 2)        # resident weight block (per review)
    k1 = _pick_group(N, S, per1, fixed1, budget)
    grid1 = (N // k1,)
    # TODO(synk): on v7x a whole-batch group gives grid=(1,) and uses only one
    # TensorCore; a leading spatial-half split with partial sums would recover
    # the second core for tiny batches.

    y, samp_sum, samp_ssq = pl.pallas_call(
        functools.partial(_conv_stats_kernel, k=k1, s=S, wo=Wo),
        out_shape=(jax.ShapeDtypeStruct((Cout, N * S), jnp.bfloat16),
                   jax.ShapeDtypeStruct((N, Cout, 1), jnp.float32),
                   jax.ShapeDtypeStruct((N, Cout, 1), jnp.float32)),
        grid=grid1,
        in_specs=[
            pl.BlockSpec((k1, K8, PW), lambda g: (g, 0, 0)),
            pl.BlockSpec((2, Cout, K8), lambda g: (0, 0, 0)),   # constant: no re-DMA
        ],
        out_specs=(
            pl.BlockSpec((Cout, k1 * S), lambda g: (0, g)),
            pl.BlockSpec((k1, Cout, 1), lambda g: (g, 0, 0)),
            pl.BlockSpec((k1, Cout, 1), lambda g: (g, 0, 0)),
        ),
        compiler_params=pltpu.CompilerParams(
            dimension_semantics=("parallel",), vmem_limit_bytes=vmem_limit),
        cost_estimate=pl.CostEstimate(
            flops=2 * N * S * Cout * 16 * Cin,
            transcendentals=0,
            bytes_accessed=(N * K8 * PW * 2 + 2 * Cout * K8 * 2
                            + N * S * Cout * 2 + 2 * N * Cout * 4)),
    )(xw, w8)

    # ---- pass 2 (tiny, runs once): BN batch stats + per-sample CA gates ----
    scale, shift, wca = pl.pallas_call(
        functools.partial(_bn_ca_precompute_kernel,
                          m_total=float(N * S), s_total=float(S), n=N),
        out_shape=(jax.ShapeDtypeStruct((Cout, 1), jnp.float32),
                   jax.ShapeDtypeStruct((Cout, 1), jnp.float32),
                   jax.ShapeDtypeStruct((N, Cout, 1), jnp.float32)),
        grid=(1,),
        in_specs=[
            pl.BlockSpec((N, Cout, 1), lambda g: (0, 0, 0)),
            pl.BlockSpec((N, Cout, 1), lambda g: (0, 0, 0)),
            pl.BlockSpec((Cout, 1), lambda g: (0, 0)),
            pl.BlockSpec((Cout, 1), lambda g: (0, 0)),
            pl.BlockSpec((C4, Cout), lambda g: (0, 0)),
            pl.BlockSpec((C4, 1), lambda g: (0, 0)),
            pl.BlockSpec((Cout, C4), lambda g: (0, 0)),
            pl.BlockSpec((Cout, 1), lambda g: (0, 0)),
        ],
        out_specs=(
            pl.BlockSpec((Cout, 1), lambda g: (0, 0)),
            pl.BlockSpec((Cout, 1), lambda g: (0, 0)),
            pl.BlockSpec((N, Cout, 1), lambda g: (0, 0, 0)),
        ),
    )(samp_sum, samp_ssq, gamma_m, beta_m, w1_m, b1_m, w2_m, b2_m)

    # ---- pass 3: streaming BN + CA apply (lane tile decoupled from pass 1) ----
    per3 = (2 * 2 * Cout * s128             # y bf16, double-buffered
            + 2 * 2 * 4 * Cout * s128       # xbn / xca f32 outputs, double-buffered
            + 2 * 4 * Cout * s128)          # f32 temporaries
    fixed3 = 4 * (2 * Cout + N * Cout) * 4
    k2 = _pick_group(N, S, per3, fixed3, budget)
    grid3 = (N // k2,)

    xbn_f, xca_f = pl.pallas_call(
        functools.partial(_bn_ca_apply_kernel, k=k2, s=S),
        out_shape=(jax.ShapeDtypeStruct((Cout, N * S), jnp.float32),
                   jax.ShapeDtypeStruct((Cout, N * S), jnp.float32)),
        grid=grid3,
        in_specs=[
            pl.BlockSpec((Cout, k2 * S), lambda g: (0, g)),
            pl.BlockSpec((Cout, 1), lambda g: (0, 0)),
            pl.BlockSpec((Cout, 1), lambda g: (0, 0)),
            pl.BlockSpec((k2, Cout, 1), lambda g: (g, 0, 0)),
        ],
        out_specs=(
            pl.BlockSpec((Cout, k2 * S), lambda g: (0, g)),
            pl.BlockSpec((Cout, k2 * S), lambda g: (0, g)),
        ),
        compiler_params=pltpu.CompilerParams(
            dimension_semantics=("parallel",), vmem_limit_bytes=vmem_limit),
        cost_estimate=pl.CostEstimate(
            flops=4 * N * S * Cout, transcendentals=0,
            bytes_accessed=N * S * Cout * (2 + 4 + 4)),
    )(y, scale, shift, wca)

    # lane-folded [Cout, N*S] -> NCHW (one pure-layout transpose at the end).
    xbn = xbn_f.reshape(Cout, N, Ho, Wo).transpose(1, 0, 2, 3)
    xca = xca_f.reshape(Cout, N, Ho, Wo).transpose(1, 0, 2, 3)
    return xbn, xca


# ----------------------------- reference -------------------------------------


def down_reference(x, params, ca_kernel):
    """Pure-JAX reference mirroring the PyTorch forward (for sanity checking)."""
    w_conv = params["downconv_w"]
    gamma, beta = params["bn_gamma"], params["bn_beta"]
    w1, b1 = params["ca_w1"], params["ca_b1"]
    w2, b2 = params["ca_w2"], params["ca_b2"]
    Cout, C4 = w_conv.shape[0], w_conv.shape[0] // 4
    xr = jnp.where(x >= 0, x, 0.2 * x)
    y = jax.lax.conv_general_dilated(xr, w_conv, (2, 2), ((1, 1), (1, 1)),
                                     dimension_numbers=("NCHW", "OIHW", "NCHW"))
    mean = y.mean(axis=(0, 2, 3), keepdims=True)
    var = ((y - mean) ** 2).mean(axis=(0, 2, 3), keepdims=True)
    ybn = (y - mean) / jnp.sqrt(var + 1e-5) * gamma.reshape(1, -1, 1, 1) \
        + beta.reshape(1, -1, 1, 1)
    avg = ybn.mean(axis=(2, 3), keepdims=True)          # AvgPool2d(k==spatial, 1)
    h = jnp.einsum("oc,nchw->nohw", w1.reshape(C4, Cout), avg) + b1.reshape(1, -1, 1, 1)
    h = jnp.maximum(h, 0.0)
    wg = jnp.einsum("oc,nchw->nohw", w2.reshape(Cout, C4), h) + b2.reshape(1, -1, 1, 1)
    wg = jax.nn.sigmoid(wg)
    return ybn, ybn * wg


if __name__ == "__main__":
    N, Cin, H, W = 2, 4, 16, 16
    Cout = 8
    ca_kernel = 8   # == downsampled spatial size (16 / 2)

    key = jax.random.PRNGKey(0)
    kx, k1, k2, k3, k4, k5 = jax.random.split(key, 6)
    x = jax.random.normal(kx, (N, Cin, H, W), jnp.float32)

    params = {
        "downconv_w": jax.random.normal(k1, (Cout, Cin, 4, 4), jnp.float32) * 0.1,
        "bn_gamma": jnp.ones((Cout,), jnp.float32),     # nn.BatchNorm2d default init
        "bn_beta": jnp.zeros((Cout,), jnp.float32),
        "ca_w1": jax.random.normal(k2, (Cout // 4, Cout, 1, 1), jnp.float32) * 0.3,
        "ca_b1": jax.random.normal(k3, (Cout // 4,), jnp.float32) * 0.1,
        "ca_w2": jax.random.normal(k4, (Cout, Cout // 4, 1, 1), jnp.float32) * 0.3,
        "ca_b2": jax.random.normal(k5, (Cout,), jnp.float32) * 0.1,
    }

    xbn, xca = jax.jit(lambda xv: down_forward(xv, params, ca_kernel))(x)
    jax.block_until_ready((xbn, xca))

    rbn, rca = down_reference(x, params, ca_kernel)
    assert xbn.shape == (N, Cout, H // 2, W // 2) and xca.shape == xbn.shape
    # bf16 conv inputs/weights and y intermediate (f32 accumulation) -> looser tol.
    assert jnp.allclose(xbn, rbn, atol=3e-2, rtol=3e-2)
    assert jnp.allclose(xca, rca, atol=3e-2, rtol=3e-2)
    print("KERNEL_OK")
</pallas_src>

<mosaic_0001>
module attributes {stable_mosaic.version = 11 : i64} {
  func.func @_bn_ca_precompute_kernel(%arg0: i32, %arg1: memref<2x8x1xf32, #tpu.memory_space<vmem>>, %arg2: memref<2x8x1xf32, #tpu.memory_space<vmem>>, %arg3: memref<8x1xf32, #tpu.memory_space<vmem>>, %arg4: memref<8x1xf32, #tpu.memory_space<vmem>>, %arg5: memref<2x8xf32, #tpu.memory_space<vmem>>, %arg6: memref<2x1xf32, #tpu.memory_space<vmem>>, %arg7: memref<8x2xf32, #tpu.memory_space<vmem>>, %arg8: memref<8x1xf32, #tpu.memory_space<vmem>>, %arg9: memref<8x1xf32, #tpu.memory_space<vmem>>, %arg10: memref<8x1xf32, #tpu.memory_space<vmem>>, %arg11: memref<2x8x1xf32, #tpu.memory_space<vmem>>) attributes {dimension_semantics = [#tpu.dimension_semantics<arbitrary>], iteration_bounds = array<i64: 1>, scalar_prefetch = 0 : i64, scratch_operands = 0 : i64, tpu.core_type = #tpu.core_type<tc>, window_params = [{pipeline_mode = #tpu.pipeline_mode<synchronous>, transform_indices = @transform_0, window_bounds = array<i64: 2, 8, 1>}, {pipeline_mode = #tpu.pipeline_mode<synchronous>, transform_indices = @transform_1, window_bounds = array<i64: 2, 8, 1>}, {pipeline_mode = #tpu.pipeline_mode<synchronous>, transform_indices = @transform_2, window_bounds = array<i64: 8, 1>}, {pipeline_mode = #tpu.pipeline_mode<synchronous>, transform_indices = @transform_3, window_bounds = array<i64: 8, 1>}, {pipeline_mode = #tpu.pipeline_mode<synchronous>, transform_indices = @transform_4, window_bounds = array<i64: 2, 8>}, {pipeline_mode = #tpu.pipeline_mode<synchronous>, transform_indices = @transform_5, window_bounds = array<i64: 2, 1>}, {pipeline_mode = #tpu.pipeline_mode<synchronous>, transform_indices = @transform_6, window_bounds = array<i64: 8, 2>}, {pipeline_mode = #tpu.pipeline_mode<synchronous>, transform_indices = @transform_7, window_bounds = array<i64: 8, 1>}, {pipeline_mode = #tpu.pipeline_mode<synchronous>, transform_indices = @transform_8, window_bounds = array<i64: 8, 1>}, {pipeline_mode = #tpu.pipeline_mode<synchronous>, transform_indices = @transform_9, window_bounds = array<i64: 8, 1>}, {pipeline_mode = #tpu.pipeline_mode<synchronous>, transform_indices = @transform_10, window_bounds = array<i64: 2, 8, 1>}]} {
    %c0 = arith.constant 0 : index
    %c0_0 = arith.constant 0 : index
    %c0_1 = arith.constant 0 : index
    %0 = vector.load %arg1[%c0, %c0_0, %c0_1] : memref<2x8x1xf32, #tpu.memory_space<vmem>>, vector<2x8x1xf32>
    %cst = arith.constant dense<0.000000e+00> : vector<8x1xf32>
    %1 = vector.multi_reduction <add>, %0, %cst [0] : vector<2x8x1xf32> to vector<8x1xf32>
    %c0_2 = arith.constant 0 : index
    %c0_3 = arith.constant 0 : index
    %c0_4 = arith.constant 0 : index
    %2 = vector.load %arg2[%c0_2, %c0_3, %c0_4] : memref<2x8x1xf32, #tpu.memory_space<vmem>>, vector<2x8x1xf32>
    %cst_5 = arith.constant dense<0.000000e+00> : vector<8x1xf32>
    %3 = vector.multi_reduction <add>, %2, %cst_5 [0] : vector<2x8x1xf32> to vector<8x1xf32>
    %cst_6 = arith.constant 7.812500e-03 : f32
    %4 = vector.broadcast %cst_6 : f32 to vector<8x1xf32>
    %5 = arith.mulf %1, %4 : vector<8x1xf32>
    %cst_7 = arith.constant 7.812500e-03 : f32
    %6 = vector.broadcast %cst_7 : f32 to vector<8x1xf32>
    %7 = arith.mulf %3, %6 : vector<8x1xf32>
    %8 = arith.mulf %5, %5 : vector<8x1xf32>
    %9 = arith.subf %7, %8 : vector<8x1xf32>
    %cst_8 = arith.constant 0.000000e+00 : f32
    %10 = vector.broadcast %cst_8 : f32 to vector<8x1xf32>
    %11 = arith.maximumf %9, %10 : vector<8x1xf32>
    %cst_9 = arith.constant 9.99999974E-6 : f32
    %12 = vector.broadcast %cst_9 : f32 to vector<8x1xf32>
    %13 = arith.addf %11, %12 : vector<8x1xf32>
    %14 = math.rsqrt %13 : vector<8x1xf32>
    %c0_10 = arith.constant 0 : index
    %c0_11 = arith.constant 0 : index
    %15 = vector.load %arg3[%c0_10, %c0_11] : memref<8x1xf32, #tpu.memory_space<vmem>>, vector<8x1xf32>
    %16 = arith.mulf %15, %14 : vector<8x1xf32>
    %c0_12 = arith.constant 0 : index
    %c0_13 = arith.constant 0 : index
    %17 = vector.load %arg4[%c0_12, %c0_13] : memref<8x1xf32, #tpu.memory_space<vmem>>, vector<8x1xf32>
    %18 = arith.mulf %5, %16 : vector<8x1xf32>
    %19 = arith.subf %17, %18 : vector<8x1xf32>
    %c0_14 = arith.constant 0 : index
    %c0_15 = arith.constant 0 : index
    %20 = vector.load %arg9[%c0_14, %c0_15] : memref<8x1xf32, #tpu.memory_space<vmem>>, vector<8x1xf32>
    tpu.vector_store %arg9[%c0_14, %c0_15], %16 {strides = array<i32>} : memref<8x1xf32, #tpu.memory_space<vmem>>, vector<8x1xf32>,
    %c0_16 = arith.constant 0 : index
    %c0_17 = arith.constant 0 : index
    %21 = vector.load %arg10[%c0_16, %c0_17] : memref<8x1xf32, #tpu.memory_space<vmem>>, vector<8x1xf32>
    tpu.vector_store %arg10[%c0_16, %c0_17], %19 {strides = array<i32>} : memref<8x1xf32, #tpu.memory_space<vmem>>, vector<8x1xf32>,
    %c0_18 = arith.constant 0 : index
    %c0_19 = arith.constant 0 : index
    %c0_20 = arith.constant 0 : index
    %22 = vector.load %arg1[%c0_18, %c0_19, %c0_20] : memref<2x8x1xf32, #tpu.memory_space<vmem>>, vector<1x8x1xf32>
    %23 = vector.shape_cast %22 : vector<1x8x1xf32> to vector<8x1xf32>
    %cst_21 = arith.constant 1.562500e-02 : f32
    %24 = vector.broadcast %cst_21 : f32 to vector<8x1xf32>
    %25 = arith.mulf %23, %24 : vector<8x1xf32>
    %26 = arith.mulf %25, %16 : vector<8x1xf32>
    %27 = arith.addf %26, %19 : vector<8x1xf32>
    %c0_22 = arith.constant 0 : index
    %c0_23 = arith.constant 0 : index
    %28 = vector.load %arg5[%c0_22, %c0_23] : memref<2x8xf32, #tpu.memory_space<vmem>>, vector<2x8xf32>
    %cst_24 = arith.constant dense<0.000000e+00> : vector<2x1xf32>
    %29 = tpu.matmul %28, %27, %cst_24 {dimension_numbers = #tpu.dot_dimension_numbers<[1], [0], [0], [1], [0, 0, 1, 1], [], []>} : vector<2x8xf32>, vector<8x1xf32>, vector<2x1xf32> -> vector<2x1xf32>
    %c0_25 = arith.constant 0 : index
    %c0_26 = arith.constant 0 : index
    %30 = vector.load %arg6[%c0_25, %c0_26] : memref<2x1xf32, #tpu.memory_space<vmem>>, vector<2x1xf32>
    %31 = arith.addf %29, %30 : vector<2x1xf32>
    %cst_27 = arith.constant 0.000000e+00 : f32
    %32 = vector.broadcast %cst_27 : f32 to vector<2x1xf32>
    %33 = arith.maximumf %31, %32 : vector<2x1xf32>
    %c0_28 = arith.constant 0 : index
    %c0_29 = arith.constant 0 : index
    %34 = vector.load %arg7[%c0_28, %c0_29] : memref<8x2xf32, #tpu.memory_space<vmem>>, vector<8x2xf32>
    %cst_30 = arith.constant dense<0.000000e+00> : vector<8x1xf32>
    %35 = tpu.matmul %34, %33, %cst_30 {dimension_numbers = #tpu.dot_dimension_numbers<[1], [0], [0], [1], [0, 0, 1, 1], [], []>} : vector<8x2xf32>, vector<2x1xf32>, vector<8x1xf32> -> vector<8x1xf32>
    %c0_31 = arith.constant 0 : index
    %c0_32 = arith.constant 0 : index
    %36 = vector.load %arg8[%c0_31, %c0_32] : memref<8x1xf32, #tpu.memory_space<vmem>>, vector<8x1xf32>
    %37 = arith.addf %35, %36 : vector<8x1xf32>
    %38 = arith.negf %37 : vector<8x1xf32>
    %39 = math.exp %38 : vector<8x1xf32>
    %cst_33 = arith.constant 1.000000e+00 : f32
    %40 = vector.broadcast %cst_33 : f32 to vector<8x1xf32>
    %41 = arith.addf %40, %39 : vector<8x1xf32>
    %42 = arith.divf %40, %41 : vector<8x1xf32>
    %c0_34 = arith.constant 0 : index
    %c0_35 = arith.constant 0 : index
    %c0_36 = arith.constant 0 : index
    %43 = vector.load %arg11[%c0_34, %c0_35, %c0_36] : memref<2x8x1xf32, #tpu.memory_space<vmem>>, vector<1x8x1xf32>
    %44 = vector.shape_cast %43 : vector<1x8x1xf32> to vector<8x1xf32>
    %45 = vector.shape_cast %42 : vector<8x1xf32> to vector<1x8x1xf32>
    tpu.vector_store %arg11[%c0_34, %c0_35, %c0_36], %45 {strides = array<i32>} : memref<2x8x1xf32, #tpu.memory_space<vmem>>, vector<1x8x1xf32>,
    %c1 = arith.constant 1 : index
    %c0_37 = arith.constant 0 : index
    %c0_38 = arith.constant 0 : index
    %46 = vector.load %arg1[%c1, %c0_37, %c0_38] : memref<2x8x1xf32, #tpu.memory_space<vmem>>, vector<1x8x1xf32>
    %47 = vector.shape_cast %46 : vector<1x8x1xf32> to vector<8x1xf32>
    %cst_39 = arith.constant 1.562500e-02 : f32
    %48 = vector.broadcast %cst_39 : f32 to vector<8x1xf32>
    %49 = arith.mulf %47, %48 : vector<8x1xf32>
    %50 = arith.mulf %49, %16 : vector<8x1xf32>
    %51 = arith.addf %50, %19 : vector<8x1xf32>
    %c0_40 = arith.constant 0 : index
    %c0_41 = arith.constant 0 : index
    %52 = vector.load %arg5[%c0_40, %c0_41] : memref<2x8xf32, #tpu.memory_space<vmem>>, vector<2x8xf32>
    %cst_42 = arith.constant dense<0.000000e+00> : vector<2x1xf32>
    %53 = tpu.matmul %52, %51, %cst_42 {dimension_numbers = #tpu.dot_dimension_numbers<[1], [0], [0], [1], [0, 0, 1, 1], [], []>} : vector<2x8xf32>, vector<8x1xf32>, vector<2x1xf32> -> vector<2x1xf32>
    %c0_43 = arith.constant 0 : index
    %c0_44 = arith.constant 0 : index
    %54 = vector.load %arg6[%c0_43, %c0_44] : memref<2x1xf32, #tpu.memory_space<vmem>>, vector<2x1xf32>
    %55 = arith.addf %53, %54 : vector<2x1xf32>
    %cst_45 = arith.constant 0.000000e+00 : f32
    %56 = vector.broadcast %cst_45 : f32 to vector<2x1xf32>
    %57 = arith.maximumf %55, %56 : vector<2x1xf32>
    %c0_46 = arith.constant 0 : index
    %c0_47 = arith.constant 0 : index
    %58 = vector.load %arg7[%c0_46, %c0_47] : memref<8x2xf32, #tpu.memory_space<vmem>>, vector<8x2xf32>
    %cst_48 = arith.constant dense<0.000000e+00> : vector<8x1xf32>
    %59 = tpu.matmul %58, %57, %cst_48 {dimension_numbers = #tpu.dot_dimension_numbers<[1], [0], [0], [1], [0, 0, 1, 1], [], []>} : vector<8x2xf32>, vector<2x1xf32>, vector<8x1xf32> -> vector<8x1xf32>
    %c0_49 = arith.constant 0 : index
    %c0_50 = arith.constant 0 : index
    %60 = vector.load %arg8[%c0_49, %c0_50] : memref<8x1xf32, #tpu.memory_space<vmem>>, vector<8x1xf32>
    %61 = arith.addf %59, %60 : vector<8x1xf32>
    %62 = arith.negf %61 : vector<8x1xf32>
    %63 = math.exp %62 : vector<8x1xf32>
    %cst_51 = arith.constant 1.000000e+00 : f32
    %64 = vector.broadcast %cst_51 : f32 to vector<8x1xf32>
    %65 = arith.addf %64, %63 : vector<8x1xf32>
    %66 = arith.divf %64, %65 : vector<8x1xf32>
    %c1_52 = arith.constant 1 : index
    %c0_53 = arith.constant 0 : index
    %c0_54 = arith.constant 0 : index
    %67 = vector.load %arg11[%c1_52, %c0_53, %c0_54] : memref<2x8x1xf32, #tpu.memory_space<vmem>>, vector<1x8x1xf32>
    %68 = vector.shape_cast %67 : vector<1x8x1xf32> to vector<8x1xf32>
    %69 = vector.shape_cast %66 : vector<8x1xf32> to vector<1x8x1xf32>
    tpu.vector_store %arg11[%c1_52, %c0_53, %c0_54], %69 {strides = array<i32>} : memref<2x8x1xf32, #tpu.memory_space<vmem>>, vector<1x8x1xf32>,
    return
  }
  func.func @transform_0(%arg0: i32) -> (i32, i32, i32) {
    %c0_i32 = arith.constant 0 : i32
    %c0_i32_0 = arith.constant 0 : i32
    %c0_i32_1 = arith.constant 0 : i32
    %c0_i32_2 = arith.constant 0 : i32
    return %c0_i32, %c0_i32_0, %c0_i32_1 : i32, i32, i32
  }
  func.func @transform_1(%arg0: i32) -> (i32, i32, i32) {
    %c0_i32 = arith.constant 0 : i32
    %c0_i32_0 = arith.constant 0 : i32
    %c0_i32_1 = arith.constant 0 : i32
    %c0_i32_2 = arith.constant 0 : i32
    return %c0_i32, %c0_i32_0, %c0_i32_1 : i32, i32, i32
  }
  func.func @transform_2(%arg0: i32) -> (i32, i32) {
    %c0_i32 = arith.constant 0 : i32
    %c0_i32_0 = arith.constant 0 : i32
    %c0_i32_1 = arith.constant 0 : i32
    return %c0_i32, %c0_i32_0 : i32, i32
  }
  func.func @transform_3(%arg0: i32) -> (i32, i32) {
    %c0_i32 = arith.constant 0 : i32
    %c0_i32_0 = arith.constant 0 : i32
    %c0_i32_1 = arith.constant 0 : i32
    return %c0_i32, %c0_i32_0 : i32, i32
  }
  func.func @transform_4(%arg0: i32) -> (i32, i32) {
    %c0_i32 = arith.constant 0 : i32
    %c0_i32_0 = arith.constant 0 : i32
    %c0_i32_1 = arith.constant 0 : i32
    return %c0_i32, %c0_i32_0 : i32, i32
  }
  func.func @transform_5(%arg0: i32) -> (i32, i32) {
    %c0_i32 = arith.constant 0 : i32
    %c0_i32_0 = arith.constant 0 : i32
    %c0_i32_1 = arith.constant 0 : i32
    return %c0_i32, %c0_i32_0 : i32, i32
  }
  func.func @transform_6(%arg0: i32) -> (i32, i32) {
    %c0_i32 = arith.constant 0 : i32
    %c0_i32_0 = arith.constant 0 : i32
    %c0_i32_1 = arith.constant 0 : i32
    return %c0_i32, %c0_i32_0 : i32, i32
  }
  func.func @transform_7(%arg0: i32) -> (i32, i32) {
    %c0_i32 = arith.constant 0 : i32
    %c0_i32_0 = arith.constant 0 : i32
    %c0_i32_1 = arith.constant 0 : i32
    return %c0_i32, %c0_i32_0 : i32, i32
  }
  func.func @transform_8(%arg0: i32) -> (i32, i32) {
    %c0_i32 = arith.constant 0 : i32
    %c0_i32_0 = arith.constant 0 : i32
    %c0_i32_1 = arith.constant 0 : i32
    return %c0_i32, %c0_i32_0 : i32, i32
  }
  func.func @transform_9(%arg0: i32) -> (i32, i32) {
    %c0_i32 = arith.constant 0 : i32
    %c0_i32_0 = arith.constant 0 : i32
    %c0_i32_1 = arith.constant 0 : i32
    return %c0_i32, %c0_i32_0 : i32, i32
  }
  func.func @transform_10(%arg0: i32) -> (i32, i32, i32) {
    %c0_i32 = arith.constant 0 : i32
    %c0_i32_0 = arith.constant 0 : i32
    %c0_i32_1 = arith.constant 0 : i32
    %c0_i32_2 = arith.constant 0 : i32
    return %c0_i32, %c0_i32_0, %c0_i32_1 : i32, i32, i32
  }
}

module attributes {stable_mosaic.version = 11 : i64} {
  func.func @_conv_stats_kernel(%arg0: i32, %arg1: memref<2x32x72xbf16, #tpu.memory_space<vmem>>, %arg2: memref<2x8x32xbf16, #tpu.memory_space<vmem>>, %arg3: memref<8x128xbf16, #tpu.memory_space<vmem>>, %arg4: memref<2x8x1xf32, #tpu.memory_space<vmem>>, %arg5: memref<2x8x1xf32, #tpu.memory_space<vmem>>) attributes {dimension_semantics = [#tpu.dimension_semantics<parallel>], iteration_bounds = array<i64: 1>, scalar_prefetch = 0 : i64, scratch_operands = 0 : i64, tpu.core_type = #tpu.core_type<tc>, window_params = [{transform_indices = @transform_0, window_bounds = array<i64: 2, 32, 72>}, {pipeline_mode = #tpu.pipeline_mode<synchronous>, transform_indices = @transform_1, window_bounds = array<i64: 2, 8, 32>}, {transform_indices = @transform_2, window_bounds = array<i64: 8, 128>}, {transform_indices = @transform_3, window_bounds = array<i64: 2, 8, 1>}, {transform_indices = @transform_4, window_bounds = array<i64: 2, 8, 1>}]} {
    %c0 = arith.constant 0 : index
    %c0_0 = arith.constant 0 : index
    %c0_1 = arith.constant 0 : index
    %0 = vector.load %arg2[%c0, %c0_0, %c0_1] : memref<2x8x32xbf16, #tpu.memory_space<vmem>>, vector<1x8x32xbf16>
    %1 = vector.shape_cast %0 : vector<1x8x32xbf16> to vector<8x32xbf16>
    %c1 = arith.constant 1 : index
    %c0_2 = arith.constant 0 : index
    %c0_3 = arith.constant 0 : index
    %2 = vector.load %arg2[%c1, %c0_2, %c0_3] : memref<2x8x32xbf16, #tpu.memory_space<vmem>>, vector<1x8x32xbf16>
    %3 = vector.shape_cast %2 : vector<1x8x32xbf16> to vector<8x32xbf16>
    %c0_4 = arith.constant 0 : index
    %c0_5 = arith.constant 0 : index
    %c0_6 = arith.constant 0 : index
    %4 = vector.load %arg1[%c0_4, %c0_5, %c0_6] : memref<2x32x72xbf16, #tpu.memory_space<vmem>>, vector<1x32x72xbf16>
    %5 = vector.shape_cast %4 : vector<1x32x72xbf16> to vector<32x72xbf16>
    %cst = arith.constant 0.000000e+00 : bf16
    %6 = vector.broadcast %cst : bf16 to vector<32x72xbf16>
    %7 = arith.cmpf oge, %5, %6 : vector<32x72xbf16>
    %cst_7 = arith.constant 2.001950e-01 : bf16
    %8 = vector.broadcast %cst_7 : bf16 to vector<32x72xbf16>
    %9 = arith.mulf %5, %8 : vector<32x72xbf16>
    %10 = arith.select %7, %5, %9 : vector<32x72xi1>, vector<32x72xbf16>
    %11 = vector.extract_strided_slice %10 {offsets = [0, 0], sizes = [32, 64], strides = [1, 1]} : vector<32x72xbf16> to vector<32x64xbf16>
    %cst_8 = arith.constant dense<0.000000e+00> : vector<8x64xf32>
    %12 = tpu.matmul %1, %11, %cst_8 {dimension_numbers = #tpu.dot_dimension_numbers<[1], [0], [0], [1], [0, 0, 1, 1], [], []>} : vector<8x32xbf16>, vector<32x64xbf16>, vector<8x64xf32> -> vector<8x64xf32>
    %13 = vector.extract_strided_slice %10 {offsets = [0, 8], sizes = [32, 64], strides = [1, 1]} : vector<32x72xbf16> to vector<32x64xbf16>
    %cst_9 = arith.constant dense<0.000000e+00> : vector<8x64xf32>
    %14 = tpu.matmul %3, %13, %cst_9 {dimension_numbers = #tpu.dot_dimension_numbers<[1], [0], [0], [1], [0, 0, 1, 1], [], []>} : vector<8x32xbf16>, vector<32x64xbf16>, vector<8x64xf32> -> vector<8x64xf32>
    %15 = arith.addf %12, %14 : vector<8x64xf32>
    %16 = arith.truncf %15 : vector<8x64xf32> to vector<8x64xbf16>
    %c0_10 = arith.constant 0 : index
    %c0_11 = arith.constant 0 : index
    %17 = vector.load %arg3[%c0_10, %c0_11] : memref<8x128xbf16, #tpu.memory_space<vmem>>, vector<8x64xbf16>
    tpu.vector_store %arg3[%c0_10, %c0_11], %16 {strides = array<i32>} : memref<8x128xbf16, #tpu.memory_space<vmem>>, vector<8x64xbf16>,
    %cst_12 = arith.constant dense<0.000000e+00> : vector<8xf32>
    %18 = vector.multi_reduction <add>, %15, %cst_12 [1] : vector<8x64xf32> to vector<8xf32>
    %19 = vector.shape_cast %18 : vector<8xf32> to vector<8x1xf32>
    %c0_13 = arith.constant 0 : index
    %c0_14 = arith.constant 0 : index
    %c0_15 = arith.constant 0 : index
    %20 = vector.load %arg4[%c0_13, %c0_14, %c0_15] : memref<2x8x1xf32, #tpu.memory_space<vmem>>, vector<1x8x1xf32>
    %21 = vector.shape_cast %20 : vector<1x8x1xf32> to vector<8x1xf32>
    %22 = vector.shape_cast %19 : vector<8x1xf32> to vector<1x8x1xf32>
    tpu.vector_store %arg4[%c0_13, %c0_14, %c0_15], %22 {strides = array<i32>} : memref<2x8x1xf32, #tpu.memory_space<vmem>>, vector<1x8x1xf32>,
    %23 = arith.mulf %15, %15 : vector<8x64xf32>
    %cst_16 = arith.constant dense<0.000000e+00> : vector<8xf32>
    %24 = vector.multi_reduction <add>, %23, %cst_16 [1] : vector<8x64xf32> to vector<8xf32>
    %25 = vector.shape_cast %24 : vector<8xf32> to vector<8x1xf32>
    %c0_17 = arith.constant 0 : index
    %c0_18 = arith.constant 0 : index
    %c0_19 = arith.constant 0 : index
    %26 = vector.load %arg5[%c0_17, %c0_18, %c0_19] : memref<2x8x1xf32, #tpu.memory_space<vmem>>, vector<1x8x1xf32>
    %27 = vector.shape_cast %26 : vector<1x8x1xf32> to vector<8x1xf32>
    %28 = vector.shape_cast %25 : vector<8x1xf32> to vector<1x8x1xf32>
    tpu.vector_store %arg5[%c0_17, %c0_18, %c0_19], %28 {strides = array<i32>} : memref<2x8x1xf32, #tpu.memory_space<vmem>>, vector<1x8x1xf32>,
    %c1_20 = arith.constant 1 : index
    %c0_21 = arith.constant 0 : index
    %c0_22 = arith.constant 0 : index
    %29 = vector.load %arg1[%c1_20, %c0_21, %c0_22] : memref<2x32x72xbf16, #tpu.memory_space<vmem>>, vector<1x32x72xbf16>
    %30 = vector.shape_cast %29 : vector<1x32x72xbf16> to vector<32x72xbf16>
    %cst_23 = arith.constant 0.000000e+00 : bf16
    %31 = vector.broadcast %cst_23 : bf16 to vector<32x72xbf16>
    %32 = arith.cmpf oge, %30, %31 : vector<32x72xbf16>
    %cst_24 = arith.constant 2.001950e-01 : bf16
    %33 = vector.broadcast %cst_24 : bf16 to vector<32x72xbf16>
    %34 = arith.mulf %30, %33 : vector<32x72xbf16>
    %35 = arith.select %32, %30, %34 : vector<32x72xi1>, vector<32x72xbf16>
    %36 = vector.extract_strided_slice %35 {offsets = [0, 0], sizes = [32, 64], strides = [1, 1]} : vector<32x72xbf16> to vector<32x64xbf16>
    %cst_25 = arith.constant dense<0.000000e+00> : vector<8x64xf32>
    %37 = tpu.matmul %1, %36, %cst_25 {dimension_numbers = #tpu.dot_dimension_numbers<[1], [0], [0], [1], [0, 0, 1, 1], [], []>} : vector<8x32xbf16>, vector<32x64xbf16>, vector<8x64xf32> -> vector<8x64xf32>
    %38 = vector.extract_strided_slice %35 {offsets = [0, 8], sizes = [32, 64], strides = [1, 1]} : vector<32x72xbf16> to vector<32x64xbf16>
    %cst_26 = arith.constant dense<0.000000e+00> : vector<8x64xf32>
    %39 = tpu.matmul %3, %38, %cst_26 {dimension_numbers = #tpu.dot_dimension_numbers<[1], [0], [0], [1], [0, 0, 1, 1], [], []>} : vector<8x32xbf16>, vector<32x64xbf16>, vector<8x64xf32> -> vector<8x64xf32>
    %40 = arith.addf %37, %39 : vector<8x64xf32>
    %41 = arith.truncf %40 : vector<8x64xf32> to vector<8x64xbf16>
    %c0_27 = arith.constant 0 : index
    %c64 = arith.constant 64 : index
    %42 = vector.load %arg3[%c0_27, %c64] : memref<8x128xbf16, #tpu.memory_space<vmem>>, vector<8x64xbf16>
    tpu.vector_store %arg3[%c0_27, %c64], %41 {strides = array<i32>} : memref<8x128xbf16, #tpu.memory_space<vmem>>, vector<8x64xbf16>,
    %cst_28 = arith.constant dense<0.000000e+00> : vector<8xf32>
    %43 = vector.multi_reduction <add>, %40, %cst_28 [1] : vector<8x64xf32> to vector<8xf32>
    %44 = vector.shape_cast %43 : vector<8xf32> to vector<8x1xf32>
    %c1_29 = arith.constant 1 : index
    %c0_30 = arith.constant 0 : index
    %c0_31 = arith.constant 0 : index
    %45 = vector.load %arg4[%c1_29, %c0_30, %c0_31] : memref<2x8x1xf32, #tpu.memory_space<vmem>>, vector<1x8x1xf32>
    %46 = vector.shape_cast %45 : vector<1x8x1xf32> to vector<8x1xf32>
    %47 = vector.shape_cast %44 : vector<8x1xf32> to vector<1x8x1xf32>
    tpu.vector_store %arg4[%c1_29, %c0_30, %c0_31], %47 {strides = array<i32>} : memref<2x8x1xf32, #tpu.memory_space<vmem>>, vector<1x8x1xf32>,
    %48 = arith.mulf %40, %40 : vector<8x64xf32>
    %cst_32 = arith.constant dense<0.000000e+00> : vector<8xf32>
    %49 = vector.multi_reduction <add>, %48, %cst_32 [1] : vector<8x64xf32> to vector<8xf32>
    %50 = vector.shape_cast %49 : vector<8xf32> to vector<8x1xf32>
    %c1_33 = arith.constant 1 : index
    %c0_34 = arith.constant 0 : index
    %c0_35 = arith.constant 0 : index
    %51 = vector.load %arg5[%c1_33, %c0_34, %c0_35] : memref<2x8x1xf32, #tpu.memory_space<vmem>>, vector<1x8x1xf32>
    %52 = vector.shape_cast %51 : vector<1x8x1xf32> to vector<8x1xf32>
    %53 = vector.shape_cast %50 : vector<8x1xf32> to vector<1x8x1xf32>
    tpu.vector_store %arg5[%c1_33, %c0_34, %c0_35], %53 {strides = array<i32>} : memref<2x8x1xf32, #tpu.memory_space<vmem>>, vector<1x8x1xf32>,
    return
  }
  func.func @transform_0(%arg0: i32) -> (i32, i32, i32) {
    %c0_i32 = arith.constant 0 : i32
    %c0_i32_0 = arith.constant 0 : i32
    %c0_i32_1 = arith.constant 0 : i32
    return %arg0, %c0_i32, %c0_i32_0 : i32, i32, i32
  }
  func.func @transform_1(%arg0: i32) -> (i32, i32, i32) {
    %c0_i32 = arith.constant 0 : i32
    %c0_i32_0 = arith.constant 0 : i32
    %c0_i32_1 = arith.constant 0 : i32
    %c0_i32_2 = arith.constant 0 : i32
    return %c0_i32, %c0_i32_0, %c0_i32_1 : i32, i32, i32
  }
  func.func @transform_2(%arg0: i32) -> (i32, i32) {
    %c0_i32 = arith.constant 0 : i32
    %c0_i32_0 = arith.constant 0 : i32
    return %c0_i32, %arg0 : i32, i32
  }
  func.func @transform_3(%arg0: i32) -> (i32, i32, i32) {
    %c0_i32 = arith.constant 0 : i32
    %c0_i32_0 = arith.constant 0 : i32
    %c0_i32_1 = arith.constant 0 : i32
    return %arg0, %c0_i32, %c0_i32_0 : i32, i32, i32
  }
  func.func @transform_4(%arg0: i32) -> (i32, i32, i32) {
    %c0_i32 = arith.constant 0 : i32
    %c0_i32_0 = arith.constant 0 : i32
    %c0_i32_1 = arith.constant 0 : i32
    return %arg0, %c0_i32, %c0_i32_0 : i32, i32, i32
  }
}

module attributes {stable_mosaic.version = 11 : i64} {
  func.func @_bn_ca_apply_kernel(%arg0: i32, %arg1: memref<8x128xbf16, #tpu.memory_space<vmem>>, %arg2: memref<8x1xf32, #tpu.memory_space<vmem>>, %arg3: memref<8x1xf32, #tpu.memory_space<vmem>>, %arg4: memref<2x8x1xf32, #tpu.memory_space<vmem>>, %arg5: memref<8x128xf32, #tpu.memory_space<vmem>>, %arg6: memref<8x128xf32, #tpu.memory_space<vmem>>) attributes {dimension_semantics = [#tpu.dimension_semantics<parallel>], iteration_bounds = array<i64: 1>, scalar_prefetch = 0 : i64, scratch_operands = 0 : i64, tpu.core_type = #tpu.core_type<tc>, window_params = [{transform_indices = @transform_0, window_bounds = array<i64: 8, 128>}, {pipeline_mode = #tpu.pipeline_mode<synchronous>, transform_indices = @transform_1, window_bounds = array<i64: 8, 1>}, {pipeline_mode = #tpu.pipeline_mode<synchronous>, transform_indices = @transform_2, window_bounds = array<i64: 8, 1>}, {transform_indices = @transform_3, window_bounds = array<i64: 2, 8, 1>}, {transform_indices = @transform_4, window_bounds = array<i64: 8, 128>}, {transform_indices = @transform_5, window_bounds = array<i64: 8, 128>}]} {
    %c0 = arith.constant 0 : index
    %c0_0 = arith.constant 0 : index
    %0 = vector.load %arg1[%c0, %c0_0] : memref<8x128xbf16, #tpu.memory_space<vmem>>, vector<8x128xbf16>
    %1 = arith.extf %0 : vector<8x128xbf16> to vector<8x128xf32>
    %c0_1 = arith.constant 0 : index
    %c0_2 = arith.constant 0 : index
    %2 = vector.load %arg2[%c0_1, %c0_2] : memref<8x1xf32, #tpu.memory_space<vmem>>, vector<8x1xf32>
    %3 = vector.broadcast %2 : vector<8x1xf32> to vector<8x128xf32>
    %4 = arith.mulf %1, %3 : vector<8x128xf32>
    %c0_3 = arith.constant 0 : index
    %c0_4 = arith.constant 0 : index
    %5 = vector.load %arg3[%c0_3, %c0_4] : memref<8x1xf32, #tpu.memory_space<vmem>>, vector<8x1xf32>
    %6 = vector.broadcast %5 : vector<8x1xf32> to vector<8x128xf32>
    %7 = arith.addf %4, %6 : vector<8x128xf32>
    %c0_5 = arith.constant 0 : index
    %c0_6 = arith.constant 0 : index
    %8 = vector.load %arg5[%c0_5, %c0_6] : memref<8x128xf32, #tpu.memory_space<vmem>>, vector<8x128xf32>
    tpu.vector_store %arg5[%c0_5, %c0_6], %7 {strides = array<i32>} : memref<8x128xf32, #tpu.memory_space<vmem>>, vector<8x128xf32>,
    %9 = vector.extract_strided_slice %7 {offsets = [0, 0], sizes = [8, 64], strides = [1, 1]} : vector<8x128xf32> to vector<8x64xf32>
    %c0_7 = arith.constant 0 : index
    %c0_8 = arith.constant 0 : index
    %c0_9 = arith.constant 0 : index
    %10 = vector.load %arg4[%c0_7, %c0_8, %c0_9] : memref<2x8x1xf32, #tpu.memory_space<vmem>>, vector<1x8x1xf32>
    %11 = vector.shape_cast %10 : vector<1x8x1xf32> to vector<8x1xf32>
    %12 = vector.broadcast %11 : vector<8x1xf32> to vector<8x64xf32>
    %13 = arith.mulf %9, %12 : vector<8x64xf32>
    %c0_10 = arith.constant 0 : index
    %c0_11 = arith.constant 0 : index
    %14 = vector.load %arg6[%c0_10, %c0_11] : memref<8x128xf32, #tpu.memory_space<vmem>>, vector<8x64xf32>
    tpu.vector_store %arg6[%c0_10, %c0_11], %13 {strides = array<i32>} : memref<8x128xf32, #tpu.memory_space<vmem>>, vector<8x64xf32>,
    %15 = vector.extract_strided_slice %7 {offsets = [0, 64], sizes = [8, 64], strides = [1, 1]} : vector<8x128xf32> to vector<8x64xf32>
    %c1 = arith.constant 1 : index
    %c0_12 = arith.constant 0 : index
    %c0_13 = arith.constant 0 : index
    %16 = vector.load %arg4[%c1, %c0_12, %c0_13] : memref<2x8x1xf32, #tpu.memory_space<vmem>>, vector<1x8x1xf32>
    %17 = vector.shape_cast %16 : vector<1x8x1xf32> to vector<8x1xf32>
    %18 = vector.broadcast %17 : vector<8x1xf32> to vector<8x64xf32>
    %19 = arith.mulf %15, %18 : vector<8x64xf32>
    %c0_14 = arith.constant 0 : index
    %c64 = arith.constant 64 : index
    %20 = vector.load %arg6[%c0_14, %c64] : memref<8x128xf32, #tpu.memory_space<vmem>>, vector<8x64xf32>
    tpu.vector_store %arg6[%c0_14, %c64], %19 {strides = array<i32>} : memref<8x128xf32, #tpu.memory_space<vmem>>, vector<8x64xf32>,
    return
  }
  func.func @transform_0(%arg0: i32) -> (i32, i32) {
    %c0_i32 = arith.constant 0 : i32
    %c0_i32_0 = arith.constant 0 : i32
    return %c0_i32, %arg0 : i32, i32
  }
  func.func @transform_1(%arg0: i32) -> (i32, i32) {
    %c0_i32 = arith.constant 0 : i32
    %c0_i32_0 = arith.constant 0 : i32
    %c0_i32_1 = arith.constant 0 : i32
    return %c0_i32, %c0_i32_0 : i32, i32
  }
  func.func @transform_2(%arg0: i32) -> (i32, i32) {
    %c0_i32 = arith.constant 0 : i32
    %c0_i32_0 = arith.constant 0 : i32
    %c0_i32_1 = arith.constant 0 : i32
    return %c0_i32, %c0_i32_0 : i32, i32
  }
  func.func @transform_3(%arg0: i32) -> (i32, i32, i32) {
    %c0_i32 = arith.constant 0 : i32
    %c0_i32_0 = arith.constant 0 : i32
    %c0_i32_1 = arith.constant 0 : i32
    return %arg0, %c0_i32, %c0_i32_0 : i32, i32, i32
  }
  func.func @transform_4(%arg0: i32) -> (i32, i32) {
    %c0_i32 = arith.constant 0 : i32
    %c0_i32_0 = arith.constant 0 : i32
    return %c0_i32, %arg0 : i32, i32
  }
  func.func @transform_5(%arg0: i32) -> (i32, i32) {
    %c0_i32 = arith.constant 0 : i32
    %c0_i32_0 = arith.constant 0 : i32
    return %c0_i32, %arg0 : i32, i32
  }
}

</mosaic_0001>

<bundles_post_ra>
// kernel: _lambda_.5
= control target key start
LH: loop header
LB: loop body
LE: loop exit
PB: predicated region body
PF: predicated region fallthrough
CT: control target
= control target key end

     0   :  { %v67_v0 = vmov 0   ;;  %vm43_vm0 = vcmask 523264   ;;  %vm53_vm1 = vcmask 1048064   ;;  %s122_s3 = inlined_call_operand.vmem [shape: f32[2,8,1], index: 3, kind: input, shape index: {}]   ;;  %s123_s1 = inlined_call_operand.vmem [shape: f32[8,1], index: 1, kind: input, shape index: {}]   ;;  %s124_s2 = inlined_call_operand.vmem [shape: f32[8,1], index: 2, kind: input, shape index: {}]   ;;  %s125_s0 = inlined_call_operand.vmem [shape: bf16[8,128], index: 0, kind: input, shape index: {}]   ;;  %s126_s4 = inlined_call_operand.vmem [shape: f32[8,128], index: 4, kind: output, shape index: {0}]   ;;  %s127_s5 = inlined_call_operand.vmem [shape: f32[8,128], index: 5, kind: output, shape index: {1}]  }
   0x1   :  { %66 = vset.pattern.permute.xlu1 %v67_v0  ;;  %65 = vset.pattern.permute.xlu0 %v67_v0  ;;  %v36_v1 = vld [vmem:[%s122_s3] sm:$0xff]  ;;  %v63_v3 = vld [vmem:[%s122_s3 + $0x8] sm:$0xff] }
   0x2   :  { %v21_v2 = vld [vmem:[%s123_s1] sm:$0xff]  ;;  %39 = vperm.xlu1 %66, %v36_v1  }
   0x3   :  { %24 = vperm.xlu0 %65, %v21_v2   ;;  %v28_v4 = vld [vmem:[%s124_s2] sm:$0xff] }
   0x4   :  { %v19_v5 = vld [vmem:[%s125_s0] sm:$0xf] }
   0x5   :  { %v20_v6 = vunpack.c.l.bf16 %v19_v5 }
   0x6   :  { %49 = vperm.xlu1 %66, %v63_v3  }
   0x7   :  { %31 = vperm.xlu0 %65, %v28_v4  }
  0x7d   :  { %v40_v7 = vpop.permute.xlu1 %39 }
  0x7e   :  { %v25_v8 = vpop.permute.xlu0 %24 }
  0x7f   :  { %v27_v9 = vmul.f32 %v25_v8, %v20_v6 }
  0x81   :  { %v50_v12 = vpop.permute.xlu1 %49 }
  0x82   :  { %v32_v10 = vpop.permute.xlu0 %31 }
  0x83   :  { %v34_v11 = vadd.f32 %v32_v10, %v27_v9 }
  0x85   :  { %35 = vst [vmem:[%s126_s4] sm:$0xff] %v34_v11  ;;  %v42_v13 = vmul.f32 %v40_v7, %v34_v11  ;;  %v52_v14 = vmul.f32 %v50_v12, %v34_v11 }
  0x87   :  { %44 = vst.msk [vmem:[%s127_s5] sm:$0xff] %vm43_vm0, %v42_v13 }
  0x88   :  { %54 = vst.msk [vmem:[%s127_s5] sm:$0xff] %vm53_vm1, %v52_v14 }

// kernel: _lambda_.3
= control target key start
LH: loop header
LB: loop body
LE: loop exit
PB: predicated region body
PF: predicated region fallthrough
CT: control target
= control target key end

     0   :  { %v366_v3 = vmov 0.0   ;;  %vm367_vm2 = vmmov 0   ;;  %s368_s29 = smov 120   ;;  %vm51_vm9 = vcmask 261120   ;;  %vm143_vm10 = vcmask 523264   ;;  %s369_s10 = smov 64   ;;  %s467_s0 = inlined_call_operand.vmem [shape: bf16[2,32,72], index: 0, kind: input, shape index: {}]   ;;  %s468_s1 = inlined_call_operand.vmem [shape: bf16[2,8,32], index: 1, kind: input, shape index: {}]   ;;  %s469_s2 = inlined_call_operand.vmem [shape: bf16[8,128], index: 2, kind: output, shape index: {0}]   ;;  %s470_s3 = inlined_call_operand.vmem [shape: f32[2,8,1], index: 3, kind: output, shape index: {1}]   ;;  %s471_s4 = inlined_call_operand.vmem [shape: f32[2,8,1], index: 4, kind: output, shape index: {2}]  }
   0x1   :  { %v21_v0 = vld [vmem:[%s467_s0 + $0x8] sm:$0xf]  ;;  %v22_v1 = vld [vmem:[%s467_s0 + $0xc] sm:$0xf]  ;;  %v19_v2 = vld [vmem:[%s467_s0] sm:$0xf]  ;;  %338 = vmatprep.subr.bf16.mxu1 %v366_v3  ;;  %330 = vmatprep.subr.bf16.mxu0 %v366_v3 }
   0x2   :  { %vm25_vm0 = vcmp.ge.bf16.partialorder %v21_v0, 0  ;;  %vm26_vm1 = vcmp.ge.bf16.partialorder %v22_v1, 0  ;;  %v29_v4 = vmul.bf16 1045249613, %v21_v0  ;;  %v30_v5 = vmul.bf16 1045249613, %v22_v1  ;;  %342 = vmatprep.mubr.msk.bf16.mxu1 %vm367_vm2, %v366_v3  ;;  %334 = vmatprep.mubr.msk.bf16.mxu0 %vm367_vm2, %v366_v3 }
   0x3   :  { %v20_v6 = vld [vmem:[%s467_s0 + $0x4] sm:$0xf]  ;;  %vm23_vm3 = vcmp.ge.bf16.partialorder %v19_v2, 0  ;;  %v27_v7 = vmul.bf16 1045249613, %v19_v2  ;;  %vm141_vm11 = vcmask 519168  }
   0x4   :  { %v33_v8 = vsel %vm25_vm0, %v21_v0, %v29_v4  ;;  %v34_v9 = vsel %vm26_vm1, %v22_v1, %v30_v5  ;;  %vm24_vm4 = vcmp.ge.bf16.partialorder %v20_v6, 0  ;;  %v28_v10 = vmul.bf16 1045249613, %v20_v6  ;;  %v308_v11 = vld [vmem:[%s467_s0 + $0x18] sm:$0xf] }
   0x5   :  { %v303_v12 = vcombine.low %v33_v8, %v34_v9  ;;  %v31_v13 = vsel %vm23_vm3, %v19_v2, %v27_v7  ;;  %v309_v14 = vld [vmem:[%s467_s0 + $0x1c] sm:$0xf]  ;;  %vm161_vm5 = vcmp.ge.bf16.partialorder %v308_v11, 0  ;;  %v165_v15 = vmul.bf16 1045249613, %v308_v11 }
   0x6   :  { %v32_v16 = vsel %vm24_vm4, %v20_v6, %v28_v10  ;;  %vm162_vm6 = vcmp.ge.bf16.partialorder %v309_v14, 0  ;;  %v166_v17 = vmul.bf16 1045249613, %v309_v14  ;;  %v306_v18 = vld [vmem:[%s467_s0 + $0x10] sm:$0xf]  ;;  %vm147_vm12 = vcmask 7168  }
   0x7   :  { %47 = vrot.lane.b32.xlu0 %v303_v12, %s368_s29  ;;  %v302_v19 = vcombine.low %v31_v13, %v32_v16  ;;  %v169_v20 = vsel %vm161_vm5, %v308_v11, %v165_v15  ;;  %v307_v21 = vld [vmem:[%s467_s0 + $0x14] sm:$0xf]  ;;  %vm159_vm7 = vcmp.ge.bf16.partialorder %v306_v18, 0  ;;  %v163_v22 = vmul.bf16 1045249613, %v306_v18  ;;  %339 = vmatpush3.bf16.msra.mxu1 %v303_v12 }
   0x8   :  { %v170_v23 = vsel %vm162_vm6, %v309_v14, %v166_v17  ;;  %vm160_vm8 = vcmp.ge.bf16.partialorder %v307_v21, 0  ;;  %v164_v24 = vmul.bf16 1045249613, %v307_v21  ;;  %340 = vmatprep.subr.bf16.mxu1 %v366_v3  ;;  %v16_v29 = vld [vmem:[%s468_s1] sm:$0xf]  ;;  %vm276_vm13 = vcmask 1043968  }
   0x9   :  { %v311_v25 = vcombine.low %v169_v20, %v170_v23  ;;  %v167_v26 = vsel %vm159_vm7, %v306_v18, %v163_v22  ;;  %v301_v33 = vld [vmem:[%s468_s1 + $0x4] sm:$0xf] }
   0xa   :  { %v168_v27 = vsel %vm160_vm8, %v307_v21, %v164_v24 }
   0xb   :  { %45 = vrot.lane.b32.xlu0 %v302_v19, %s368_s29  ;;  %183 = vrot.lane.b32.xlu1 %v311_v25, %s368_s29  ;;  %v310_v28 = vcombine.low %v167_v26, %v168_v27 }
   0xc   :  { %341 = vmatpush3.bf16.msra.mxu1 %v302_v19 }
   0xd   :  { %354 = vmatprep.subr.bf16.mxu1 %v366_v3 }
   0xf   :  { %181 = vrot.lane.b32.xlu1 %v310_v28, %s368_s29  ;;  %343 = vmatmul.mubr.msk.bf16.vlgmr.msra.gmra.mxu1 %vm51_vm9, %v16_v29 }
  0x10   :  { %355 = vmatpush3.bf16.msra.mxu1 %v311_v25  ;;  %358 = vmatprep.mubr.msk.bf16.mxu1 %vm367_vm2, %v366_v3 }
  0x11   :  { %356 = vmatprep.subr.bf16.mxu1 %v366_v3 }
  0x14   :  { %357 = vmatpush3.bf16.msra.mxu1 %v310_v28 }
  0x17   :  { %359 = vmatmul.mubr.msk.bf16.vlgmr.msra.gmra.mxu1 %vm51_vm9, %v16_v29 }
  0x79   :  { %v48_v30 = vpop.permute.xlu0 %47 }
  0x7a   :  { %331 = vmatpush3.bf16.msra.mxu0 %v48_v30 }
  0x7b   :  { %332 = vmatprep.subr.bf16.mxu0 %v366_v3 }
  0x7d   :  { %v46_v31 = vpop.permute.xlu0 %45  ;;  %v184_v32 = vpop.permute.xlu1 %183 }
  0x7e   :  { %333 = vmatpush3.bf16.msra.mxu0 %v46_v31 }
  0x7f   :  { %346 = vmatprep.subr.bf16.mxu0 %v366_v3 }
  0x81   :  { %335 = vmatmul.mubr.msk.bf16.vlgmr.msra.gmra.mxu0 %vm51_vm9, %v301_v33  ;;  %v182_v34 = vpop.permute.xlu1 %181 }
  0x82   :  { %347 = vmatpush3.bf16.msra.mxu0 %v184_v32  ;;  %350 = vmatprep.mubr.msk.bf16.mxu0 %vm367_vm2, %v366_v3 }
  0x83   :  { %348 = vmatprep.subr.bf16.mxu0 %v366_v3 }
  0x86   :  { %349 = vmatpush3.bf16.msra.mxu0 %v182_v34 }
  0x89   :  { %351 = vmatmul.mubr.msk.bf16.vlgmr.msra.gmra.mxu0 %vm51_vm9, %v301_v33 }
  0xcf   :  { %v134_v35 = vpop.f32.mrf.mxu1 }
  0xd1   :  { %v344_v36 = vpop.f32.mrf.mxu1 }
  0xd3   :  { %v137_v37 = vpop.f32.mrf.mxu1 }
  0xd5   :  { %v345_v38 = vpop.f32.mrf.mxu1 }
  0xd7   :  { %v263_v39 = vpop.f32.mrf.mxu1 }
  0xd9   :  { %v360_v40 = vpop.f32.mrf.mxu1 }
  0xdb   :  { %v266_v41 = vpop.f32.mrf.mxu1 }
  0xdd   :  { %v361_v42 = vpop.f32.mrf.mxu1 }
 0x141   :  { %v89_v43 = vpop.f32.mrf.mxu0 }
 0x142   :  { %v135_v44 = vadd.f32 %v134_v35, %v89_v43 }
 0x143   :  { %v336_v45 = vpop.f32.mrf.mxu0 }
 0x144   :  { %v140_v46 = vpack.c.bf16 %v135_v44, %v135_v44  ;;  %v144_v47 = vsel %vm143_vm10, %v135_v44, 0.0  ;;  %v149_v48 = vmul.f32 %v135_v44, %v135_v44 }
 0x145   :  { %v92_v49 = vpop.f32.mrf.mxu0  ;;  %145 = vadd.xlane.f32.xlu0 %v144_v47 }
 0x146   :  { %v150_v50 = vsel %vm143_vm10, %v149_v48, 0.0  ;;  %142 = vst.msk [vmem:[%s469_s2] sm:$0xf] %vm141_vm11, %v140_v46 }
 0x147   :  { %v337_v51 = vpop.f32.mrf.mxu0  ;;  %151 = vadd.xlane.f32.xlu1 %v150_v50 }
 0x149   :  { %v221_v52 = vpop.f32.mrf.mxu0 }
 0x14a   :  { %v264_v53 = vadd.f32 %v263_v39, %v221_v52 }
 0x14b   :  { %v352_v54 = vpop.f32.mrf.mxu0 }
 0x14c   :  { %v278_v55 = vsel %vm143_vm10, %v264_v53, 0.0  ;;  %v283_v56 = vmul.f32 %v264_v53, %v264_v53  ;;  %v317_v60 = vpack.c.bf16 %v264_v53, %v264_v53 }
 0x14d   :  { %v224_v57 = vpop.f32.mrf.mxu0  ;;  %279 = vadd.xlane.f32.xlu0 %v278_v55 }
 0x14e   :  { %v284_v59 = vsel %vm143_vm10, %v283_v56, 0.0 }
 0x14f   :  { %v353_v58 = vpop.f32.mrf.mxu0 }
 0x151   :  { %285 = vadd.xlane.f32.xlu0 %v284_v59 }
 0x158   :  { %273 = vrot.lane.b32.xlu1 %v317_v60, %s369_s10 }
 0x1ce   :  { %v146_v61 = vpop.xlane.xlu0 %145 }
 0x1cf   :  { %148 = vst.msk [vmem:[%s470_s3] sm:$0xff] %vm147_vm12, %v146_v61 }
 0x1d0   :  { %v152_v62 = vpop.xlane.xlu1 %151 }
 0x1d1   :  { %153 = vst.msk [vmem:[%s471_s4] sm:$0xff] %vm147_vm12, %v152_v62 }
 0x1d4   :  { %v274_v63 = vpop.permute.xlu1 %273 }
 0x1d5   :  { %277 = vst.msk [vmem:[%s469_s2] sm:$0xf] %vm276_vm13, %v274_v63 }
 0x1d6   :  { %v280_v0 = vpop.xlane.xlu0 %279 }
 0x1d7   :  { %315 = vst.msk [vmem:[%s470_s3 + $0x8] sm:$0xff] %vm147_vm12, %v280_v0 }
 0x1da   :  { %v286_v1 = vpop.xlane.xlu0 %285 }
 0x1db   :  { %316 = vst.msk [vmem:[%s471_s4 + $0x8] sm:$0xff] %vm147_vm12, %v286_v1 }

// kernel: _lambda_.4
= control target key start
LH: loop header
LB: loop body
LE: loop exit
PB: predicated region body
PF: predicated region fallthrough
CT: control target
= control target key end

     0   :  { %vm34_vm0 = vcmask 7168   ;;  %v454_v0 = vmov 0.0   ;;  %vm455_vm1 = vmmov 0   ;;  %vm63_vm2 = vcmask 64512   ;;  %s579_s0 = inlined_call_operand.vmem [shape: f32[2,8,1], index: 0, kind: input, shape index: {}]   ;;  %s580_s1 = inlined_call_operand.vmem [shape: f32[2,8,1], index: 1, kind: input, shape index: {}]   ;;  %s581_s2 = inlined_call_operand.vmem [shape: f32[8,1], index: 2, kind: input, shape index: {}]   ;;  %s582_s3 = inlined_call_operand.vmem [shape: f32[8,1], index: 3, kind: input, shape index: {}]   ;;  %s583_s8 = inlined_call_operand.vmem [shape: f32[8,1], index: 8, kind: output, shape index: {0}]   ;;  %s584_s9 = inlined_call_operand.vmem [shape: f32[8,1], index: 9, kind: output, shape index: {1}]   ;;  %s585_s4 = inlined_call_operand.vmem [shape: f32[2,8], index: 4, kind: input, shape index: {}]   ;;  %s586_s5 = inlined_call_operand.vmem [shape: f32[2,1], index: 5, kind: input, shape index: {}]   ;;  %s587_s6 = inlined_call_operand.vmem [shape: f32[8,2], index: 6, kind: input, shape index: {}]   ;;  %s588_s7 = inlined_call_operand.vmem [shape: f32[8,1], index: 7, kind: input, shape index: {}]   ;;  %s589_s10 = inlined_call_operand.vmem [shape: f32[2,8,1], index: 10, kind: output, shape index: {2}]  }
   0x1   :  { %422 = vmatprep.subr.mxu0 %v454_v0  ;;  %v32_v1 = vld [vmem:[%s579_s0] sm:$0xff]  ;;  %v33_v2 = vld [vmem:[%s579_s0 + $0x8] sm:$0xff]  ;;  %424 = vmatprep.mubr.msk.f32.mxu0 %vm455_vm1, %v454_v0  ;;  %vm144_vm3 = vcmask 1041408   ;;  %vm140_vm4 = vcmask 15360  }
   0x2   :  { %v38_v3 = vld [vmem:[%s580_s1] sm:$0xff]  ;;  %v35_v4 = vsel %vm34_vm0, %v32_v1, 0.0  ;;  %v36_v5 = vsel %vm34_vm0, %v33_v2, 0.0  ;;  %v39_v6 = vld [vmem:[%s580_s1 + $0x8] sm:$0xff]  ;;  %427 = vmatprep.subr.mxu1 %v454_v0  ;;  %429 = vmatprep.mubr.msk.f32.mxu1 %vm455_vm1, %v454_v0  ;;  %v58_v18 = vmul.f32 0.015625, %v32_v1  ;;  %v227_v19 = vmul.f32 0.015625, %v33_v2 }
   0x3   :  { %v40_v7 = vsel %vm34_vm0, %v38_v3, 0.0  ;;  %v37_v8 = vadd.f32 %v36_v5, %v35_v4  ;;  %v41_v9 = vsel %vm34_vm0, %v39_v6, 0.0  ;;  %v50_v17 = vld [vmem:[%s581_s2] sm:$0xff] }
   0x4   :  { %v42_v10 = vadd.f32 %v41_v9, %v40_v7  ;;  %v52_v22 = vld [vmem:[%s582_s3] sm:$0xff] }
   0x5   :  { %v43_v11 = vmul.f32 0.0078125, %v37_v8  ;;  %v61_v28 = vld [vmem:[%s585_s4] sm:$0x3] }
   0x6   :  { %v44_v12 = vmul.f32 0.0078125, %v42_v10  ;;  %v230_v30 = vld [vmem:[%s585_s4] sm:$0x3] }
   0x7   :  { %v45_v13 = vmul.f32 %v43_v11, %v43_v11  ;;  %v62_v31 = vld [vmem:[%s586_s5] sm:$0x3] }
   0x8   :  { %v231_v35 = vld [vmem:[%s586_s5] sm:$0x3] }
   0x9   :  { %v46_v14 = vsub.f32 %v44_v12, %v45_v13  ;;  %v138_v37 = vld [vmem:[%s587_s6] sm:$0xff] }
   0xa   :  { %v139_v42 = vld [vmem:[%s588_s7] sm:$0xff] }
   0xb   :  { %v47_v15 = vmax.f32 %v46_v14, 0.0 }
   0xd   :  { %v48_v16 = vadd.f32 1e-05, %v47_v15 }
   0xf   :  { %444 = vrsqrt.f32 %v48_v16 }
  0x1c   :  { %v445_v20 = vpop.eup %444 }
  0x1d   :  { %v51_v21 = vmul.f32 %v445_v20, %v50_v17 }
  0x1f   :  { %v53_v23 = vmul.f32 %v51_v21, %v43_v11  ;;  %55 = vst.msk [vmem:[%s583_s8] sm:$0xff] %vm34_vm0, %v51_v21  ;;  %v59_v24 = vmul.f32 %v58_v18, %v51_v21  ;;  %v228_v25 = vmul.f32 %v227_v19, %v51_v21 }
  0x21   :  { %v54_v26 = vsub.f32 %v52_v22, %v53_v23 }
  0x23   :  { %56 = vst.msk [vmem:[%s584_s9] sm:$0xff] %vm34_vm0, %v54_v26  ;;  %v60_v27 = vadd.f32 %v59_v24, %v54_v26  ;;  %v229_v29 = vadd.f32 %v228_v25, %v54_v26 }
  0x25   :  { %423 = vmatpush3.msra.mxu0 %v60_v27 }
  0x26   :  { %425 = vmatmul.mubr.msk.f32.vlgmr.msra.gmra.mxu0 %vm63_vm2, %v61_v28  ;;  %432 = vmatprep.subr.mxu0 %v454_v0 }
  0x27   :  { %433 = vmatpush3.msra.mxu0 %v229_v29  ;;  %434 = vmatprep.mubr.msk.f32.mxu0 %vm455_vm1, %v454_v0 }
  0x2a   :  { %435 = vmatmul.mubr.msk.f32.vlgmr.msra.gmra.mxu0 %vm63_vm2, %v230_v30 }
  0xe6   :  { %v133_v32 = vpop.f32.mrf.mxu0 }
  0xe7   :  { %v134_v33 = vadd.f32 %v133_v32, %v62_v31 }
  0xe8   :  { %v426_v34 = vpop.f32.mrf.mxu0 }
  0xe9   :  { %v137_v36 = vmax.f32 %v134_v33, 0.0 }
  0xea   :  { %v301_v38 = vpop.f32.mrf.mxu0 }
  0xeb   :  { %v302_v39 = vadd.f32 %v301_v38, %v231_v35  ;;  %428 = vmatpush3.msk.msra.mxu1 %vm144_vm3, %v137_v36 }
  0xec   :  { %v436_v40 = vpop.f32.mrf.mxu0  ;;  %430 = vmatmul.mubr.msk.f32.vlgmr.msra.gmra.mxu1 %vm140_vm4, %v138_v37  ;;  %437 = vmatprep.subr.mxu1 %v454_v0 }
  0xed   :  { %v305_v41 = vmax.f32 %v302_v39, 0.0  ;;  %439 = vmatprep.mubr.msk.f32.mxu1 %vm455_vm1, %v454_v0 }
  0xef   :  { %438 = vmatpush3.msk.msra.mxu1 %vm144_vm3, %v305_v41 }
  0xf0   :  { %440 = vmatmul.mubr.msk.f32.vlgmr.msra.gmra.mxu1 %vm140_vm4, %v138_v37 }
 0x1ac   :  { %v214_v43 = vpop.f32.mrf.mxu1 }
 0x1ad   :  { %v215_v44 = vadd.f32 %v214_v43, %v139_v42 }
 0x1ae   :  { %v431_v45 = vpop.f32.mrf.mxu1 }
 0x1af   :  { %v407_v46 = vmul.f32 -1.442695, %v215_v44 }
 0x1b0   :  { %v380_v47 = vpop.f32.mrf.mxu1 }
 0x1b1   :  { %446 = vpow2.f32 %v407_v46  ;;  %v381_v48 = vadd.f32 %v380_v47, %v139_v42 }
 0x1b2   :  { %v441_v49 = vpop.f32.mrf.mxu1 }
 0x1b3   :  { %v412_v50 = vmul.f32 -1.442695, %v381_v48 }
 0x1b5   :  { %448 = vpow2.f32 %v412_v50 }
 0x1be   :  { %v447_v51 = vpop.eup %446 }
 0x1bf   :  { %v221_v52 = vadd.f32 1.0, %v447_v51 }
 0x1c1   :  { %450 = vrcp.f32 %v221_v52 }
 0x1c2   :  { %v449_v53 = vpop.eup %448 }
 0x1c3   :  { %v387_v54 = vadd.f32 1.0, %v449_v53 }
 0x1c5   :  { %452 = vrcp.f32 %v387_v54 }
 0x1ce   :  { %v451_v55 = vpop.eup %450 }
 0x1cf   :  { %224 = vst.msk [vmem:[%s589_s10] sm:$0xff] %vm34_vm0, %v451_v55 }
 0x1d2   :  { %v453_v56 = vpop.eup %452 }
 0x1d3   :  { %413 = vst.msk [vmem:[%s589_s10 + $0x8] sm:$0xff] %vm34_vm0, %v453_v56 }

</bundles_post_ra>
